<compile_context>
chip_gen: v7x
topology: tpu7x:2x2x1
jax: 0.10.0
libtpu: 0.0.40
codegen_flags: <defaults>
</compile_context>

<pallas_src>
import jax
import jax.numpy as jnp
from jax.experimental import pallas as pl
from jax.experimental.pallas import tpu as pltpu


def _round_up(x, m):
    return ((x + m - 1) // m) * m


def _siamese_head_kernel(x_ref, w1_ref, b1_ref, w2_ref, b2_ref,
                         w3_ref, b3_ref, out_ref):
    """[tb, K0] pooled+concat Siamese features -> [tb, C0] padded bf16 logits.

    Fused MXU chain (backbone projection pre-folded into W1 at init):
      h = relu(x @ W1f + b1f); h = relu(h @ W2 + b2); out = h @ W3 + b3
    Matmuls run in the weights' dtype (bf16) with f32 accumulation; bias adds
    and ReLUs stay f32 (v5e has no bf16 VPU path); store is bf16.
    """
    # TODO(synk): the full Swin backbone (shifted-window attention blocks,
    # patch merging, norms, relative position bias) is not reproduced; the
    # backbone is approximated by its shared patch-embedding projection +
    # global token mean pooling (Siamese weight sharing preserved).
    mm_dtype = w1_ref.dtype
    h = jnp.dot(x_ref[...], w1_ref[...],
                preferred_element_type=jnp.float32) + b1_ref[...]
    h = jnp.maximum(h, 0.0)                       # ReLU; Dropout(0.2) = identity
    h = jnp.dot(h.astype(mm_dtype), w2_ref[...],
                preferred_element_type=jnp.float32) + b2_ref[...]
    h = jnp.maximum(h, 0.0)                       # ReLU; Dropout(0.2) = identity
    out = jnp.dot(h.astype(mm_dtype), w3_ref[...],
                  preferred_element_type=jnp.float32) + b3_ref[...]
    out_ref[...] = out.astype(out_ref.dtype)      # bf16 lane-dense store


def _block_mean_features(x_nchw, patch):
    """NCHW image -> [B, patch*patch*C] spatial block-mean.

    Identical to mean-over-tokens of the non-overlapping P x P NHWC patch
    unfold (same (p_i, p_j, c) feature ordering), but reduces the full image
    in its native NCHW layout and only transposes the tiny pooled tensor.
    """
    B, C, H, W = x_nchw.shape
    assert H % patch == 0 and W % patch == 0
    x = x_nchw.reshape(B, C, H // patch, patch, W // patch, patch)
    x = jnp.mean(x, axis=(2, 4))                               # [B, C, p, p]
    x = jnp.transpose(x, (0, 2, 3, 1))                         # [B, p, p, C] (tiny)
    return x.reshape(B, patch * patch * C)


def init_params(key, *, in_chans=3, patch=4, embed_dim=32,
                h1=512, h2=128, num_classes=4, matmul_dtype=jnp.bfloat16):
    """Synthetic parameters (PyTorch-Linear-style uniform init), with the
    shared Siamese patch projection folded block-diagonally into fc1, and all
    matmul dims zero-padded to 128-lane multiples.

    w1 : [K0, H1p]  == Wp_blockdiag @ W1   (folded in f32, stored bf16)
    b1 : [1, H1p]   == bp_blockdiag @ W1 + b1
    w2 : [H1p, H2p];  w3 : [H2p, C0];  biases stay f32.
    """
    d_patch = patch * patch * in_chans
    f32 = jnp.float32

    def linear(k, fan_in, fan_out):
        lim = 1.0 / float(fan_in) ** 0.5
        kw, kb = jax.random.split(k)
        w = jax.random.uniform(kw, (fan_in, fan_out), f32, -lim, lim)
        b = jax.random.uniform(kb, (1, fan_out), f32, -lim, lim)
        return w, b

    k0, k1, k2, k3 = jax.random.split(key, 4)
    wp, bp = linear(k0, d_patch, embed_dim)          # shared backbone projection
    w1, b1 = linear(k1, 2 * embed_dim, h1)           # Linear(2E, 512)
    w2, b2 = linear(k2, h1, h2)                      # Linear(512, 128)
    w3, b3 = linear(k3, h2, num_classes)             # Linear(128, num_classes)

    K0 = _round_up(2 * d_patch, 128)
    E0 = _round_up(2 * embed_dim, 128)
    H1p = _round_up(h1, 128)
    H2p = _round_up(h2, 128)
    C0 = _round_up(num_classes, 128)

    # Block-diagonal Siamese projection: [f1|f2] @ wp_big == [emb1|emb2].
    wp_big = jnp.zeros((K0, E0), f32)
    wp_big = wp_big.at[:d_patch, :embed_dim].set(wp)
    wp_big = wp_big.at[d_patch:2 * d_patch, embed_dim:2 * embed_dim].set(wp)
    bp_big = jnp.zeros((1, E0), f32)
    bp_big = bp_big.at[:, :embed_dim].set(bp)
    bp_big = bp_big.at[:, embed_dim:2 * embed_dim].set(bp)

    w1_big = jnp.zeros((E0, H1p), f32).at[:2 * embed_dim, :h1].set(w1)
    b1_big = jnp.zeros((1, H1p), f32).at[:, :h1].set(b1)

    # Fold the backbone projection into fc1 (exact: no nonlinearity between).
    w1_fused = wp_big @ w1_big                       # [K0, H1p], f32
    b1_fused = bp_big @ w1_big + b1_big              # [1, H1p], f32

    w2_big = jnp.zeros((H1p, H2p), f32).at[:h1, :h2].set(w2)
    b2_big = jnp.zeros((1, H2p), f32).at[:, :h2].set(b2)
    w3_big = jnp.zeros((H2p, C0), f32).at[:h2, :num_classes].set(w3)
    b3_big = jnp.zeros((1, C0), f32).at[:, :num_classes].set(b3)

    md = matmul_dtype
    return dict(
        w1=w1_fused.astype(md), b1=b1_fused,
        w2=w2_big.astype(md), b2=b2_big,
        w3=w3_big.astype(md), b3=b3_big,
        d_in=2 * d_patch, num_classes=num_classes, patch=patch,
    )


def isr_siamese_forward(input1, input2, params, *, block_rows=1024):
    patch = params["patch"]
    d_in = params["d_in"]
    num_classes = params["num_classes"]
    w1, b1 = params["w1"], params["b1"]
    w2, b2 = params["w2"], params["b2"]
    w3, b3 = params["w3"], params["b3"]

    # Spatial block-mean replaces the patch unfold + token mean; reduce in
    # native NCHW layout, reorder only the pooled tensor.
    f1 = _block_mean_features(input1.astype(jnp.float32), patch)
    f2 = _block_mean_features(input2.astype(jnp.float32), patch)
    x = jnp.concatenate([f1, f2], axis=-1)                     # [B, 2*d_patch]
    B = x.shape[0]

    K0 = w1.shape[0]
    C0 = w3.shape[1]

    # Row tile: multiple of 16 (packed bf16 sublanes), as large as block_rows,
    # but keep >= 2 grid steps when B allows so both v7x TCs get work.
    Bp = _round_up(B, 16)
    tb = min(block_rows, Bp)
    if Bp // tb < 2 and Bp >= 32:
        tb = _round_up((Bp + 1) // 2, 16)
    Bp = _round_up(Bp, tb)

    x = jnp.pad(x, ((0, Bp - B), (0, K0 - d_in))).astype(w1.dtype)

    const = lambda i: (0, 0)                                   # weights stay resident
    out = pl.pallas_call(
        _siamese_head_kernel,
        out_shape=jax.ShapeDtypeStruct((Bp, C0), jnp.bfloat16),
        grid_spec=pltpu.PrefetchScalarGridSpec(
            num_scalar_prefetch=0,
            grid=(Bp // tb,),
            in_specs=[
                pl.BlockSpec((tb, K0), lambda i: (i, 0)),      # batch-tiled input
                pl.BlockSpec(w1.shape, const),
                pl.BlockSpec(b1.shape, const),
                pl.BlockSpec(w2.shape, const),
                pl.BlockSpec(b2.shape, const),
                pl.BlockSpec(w3.shape, const),
                pl.BlockSpec(b3.shape, const),
            ],
            out_specs=pl.BlockSpec((tb, C0), lambda i: (i, 0)),  # lane-dense stores
        ),
        compiler_params=pltpu.CompilerParams(
            dimension_semantics=("parallel",)),                # megacore: split batch
    )(x, w1, b1, w2, b2, w3, b3)

    return out[:B, :num_classes].astype(jnp.float32)


if __name__ == "__main__":
    key = jax.random.PRNGKey(0)
    k_params, k_x1, k_x2 = jax.random.split(key, 3)

    # Small shapes consistent with the module: two NCHW image inputs.
    B, C, H, W = 2, 3, 16, 16
    input1 = jax.random.normal(k_x1, (B, C, H, W), jnp.float32)
    input2 = jax.random.normal(k_x2, (B, C, H, W), jnp.float32)

    params = init_params(k_params, in_chans=C, patch=4, embed_dim=32,
                         h1=512, h2=128, num_classes=4)

    out = isr_siamese_forward(input1, input2, params)
    jax.block_until_ready(out)
    assert out.shape == (B, 4), out.shape
    print("KERNEL_OK")
</pallas_src>

<mosaic_0001>
module attributes {stable_mosaic.version = 11 : i64} {
  func.func @_siamese_head_kernel(%arg0: i32, %arg1: memref<16x128xbf16, #tpu.memory_space<vmem>>, %arg2: memref<128x512xbf16, #tpu.memory_space<vmem>>, %arg3: memref<1x512xf32, #tpu.memory_space<vmem>>, %arg4: memref<512x128xbf16, #tpu.memory_space<vmem>>, %arg5: memref<1x128xf32, #tpu.memory_space<vmem>>, %arg6: memref<128x128xbf16, #tpu.memory_space<vmem>>, %arg7: memref<1x128xf32, #tpu.memory_space<vmem>>, %arg8: memref<16x128xbf16, #tpu.memory_space<vmem>>) attributes {dimension_semantics = [#tpu.dimension_semantics<parallel>], iteration_bounds = array<i64: 1>, scalar_prefetch = 0 : i64, scratch_operands = 0 : i64, tpu.core_type = #tpu.core_type<tc>, window_params = [{transform_indices = @transform_0, window_bounds = array<i64: 16, 128>}, {pipeline_mode = #tpu.pipeline_mode<synchronous>, transform_indices = @transform_1, window_bounds = array<i64: 128, 512>}, {pipeline_mode = #tpu.pipeline_mode<synchronous>, transform_indices = @transform_2, window_bounds = array<i64: 1, 512>}, {pipeline_mode = #tpu.pipeline_mode<synchronous>, transform_indices = @transform_3, window_bounds = array<i64: 512, 128>}, {pipeline_mode = #tpu.pipeline_mode<synchronous>, transform_indices = @transform_4, window_bounds = array<i64: 1, 128>}, {pipeline_mode = #tpu.pipeline_mode<synchronous>, transform_indices = @transform_5, window_bounds = array<i64: 128, 128>}, {pipeline_mode = #tpu.pipeline_mode<synchronous>, transform_indices = @transform_6, window_bounds = array<i64: 1, 128>}, {transform_indices = @transform_7, window_bounds = array<i64: 16, 128>}]} {
    %c0 = arith.constant 0 : index
    %c0_0 = arith.constant 0 : index
    %0 = vector.load %arg1[%c0, %c0_0] : memref<16x128xbf16, #tpu.memory_space<vmem>>, vector<16x128xbf16>
    %c0_1 = arith.constant 0 : index
    %c0_2 = arith.constant 0 : index
    %1 = vector.load %arg2[%c0_1, %c0_2] : memref<128x512xbf16, #tpu.memory_space<vmem>>, vector<128x512xbf16>
    %cst = arith.constant dense<0.000000e+00> : vector<16x512xf32>
    %2 = tpu.matmul %0, %1, %cst {dimension_numbers = #tpu.dot_dimension_numbers<[1], [0], [0], [1], [0, 0, 1, 1], [], []>} : vector<16x128xbf16>, vector<128x512xbf16>, vector<16x512xf32> -> vector<16x512xf32>
    %c0_3 = arith.constant 0 : index
    %c0_4 = arith.constant 0 : index
    %3 = vector.load %arg3[%c0_3, %c0_4] : memref<1x512xf32, #tpu.memory_space<vmem>>, vector<1x512xf32>
    %4 = vector.broadcast %3 : vector<1x512xf32> to vector<16x512xf32>
    %5 = arith.addf %2, %4 : vector<16x512xf32>
    %cst_5 = arith.constant 0.000000e+00 : f32
    %6 = vector.broadcast %cst_5 : f32 to vector<16x512xf32>
    %7 = arith.maximumf %5, %6 : vector<16x512xf32>
    %8 = arith.truncf %7 : vector<16x512xf32> to vector<16x512xbf16>
    %c0_6 = arith.constant 0 : index
    %c0_7 = arith.constant 0 : index
    %9 = vector.load %arg4[%c0_6, %c0_7] : memref<512x128xbf16, #tpu.memory_space<vmem>>, vector<512x128xbf16>
    %cst_8 = arith.constant dense<0.000000e+00> : vector<16x128xf32>
    %10 = tpu.matmul %8, %9, %cst_8 {dimension_numbers = #tpu.dot_dimension_numbers<[1], [0], [0], [1], [0, 0, 1, 1], [], []>} : vector<16x512xbf16>, vector<512x128xbf16>, vector<16x128xf32> -> vector<16x128xf32>
    %c0_9 = arith.constant 0 : index
    %c0_10 = arith.constant 0 : index
    %11 = vector.load %arg5[%c0_9, %c0_10] : memref<1x128xf32, #tpu.memory_space<vmem>>, vector<1x128xf32>
    %12 = vector.broadcast %11 : vector<1x128xf32> to vector<16x128xf32>
    %13 = arith.addf %10, %12 : vector<16x128xf32>
    %cst_11 = arith.constant 0.000000e+00 : f32
    %14 = vector.broadcast %cst_11 : f32 to vector<16x128xf32>
    %15 = arith.maximumf %13, %14 : vector<16x128xf32>
    %16 = arith.truncf %15 : vector<16x128xf32> to vector<16x128xbf16>
    %c0_12 = arith.constant 0 : index
    %c0_13 = arith.constant 0 : index
    %17 = vector.load %arg6[%c0_12, %c0_13] : memref<128x128xbf16, #tpu.memory_space<vmem>>, vector<128x128xbf16>
    %cst_14 = arith.constant dense<0.000000e+00> : vector<16x128xf32>
    %18 = tpu.matmul %16, %17, %cst_14 {dimension_numbers = #tpu.dot_dimension_numbers<[1], [0], [0], [1], [0, 0, 1, 1], [], []>} : vector<16x128xbf16>, vector<128x128xbf16>, vector<16x128xf32> -> vector<16x128xf32>
    %c0_15 = arith.constant 0 : index
    %c0_16 = arith.constant 0 : index
    %19 = vector.load %arg7[%c0_15, %c0_16] : memref<1x128xf32, #tpu.memory_space<vmem>>, vector<1x128xf32>
    %20 = vector.broadcast %19 : vector<1x128xf32> to vector<16x128xf32>
    %21 = arith.addf %18, %20 : vector<16x128xf32>
    %22 = arith.truncf %21 : vector<16x128xf32> to vector<16x128xbf16>
    %c0_17 = arith.constant 0 : index
    %c0_18 = arith.constant 0 : index
    %23 = vector.load %arg8[%c0_17, %c0_18] : memref<16x128xbf16, #tpu.memory_space<vmem>>, vector<16x128xbf16>
    tpu.vector_store %arg8[%c0_17, %c0_18], %22 {strides = array<i32>} : memref<16x128xbf16, #tpu.memory_space<vmem>>, vector<16x128xbf16>,
    return
  }
  func.func @transform_0(%arg0: i32) -> (i32, i32) {
    %c0_i32 = arith.constant 0 : i32
    %c0_i32_0 = arith.constant 0 : i32
    return %arg0, %c0_i32 : i32, i32
  }
  func.func @transform_1(%arg0: i32) -> (i32, i32) {
    %c0_i32 = arith.constant 0 : i32
    %c0_i32_0 = arith.constant 0 : i32
    %c0_i32_1 = arith.constant 0 : i32
    return %c0_i32, %c0_i32_0 : i32, i32
  }
  func.func @transform_2(%arg0: i32) -> (i32, i32) {
    %c0_i32 = arith.constant 0 : i32
    %c0_i32_0 = arith.constant 0 : i32
    %c0_i32_1 = arith.constant 0 : i32
    return %c0_i32, %c0_i32_0 : i32, i32
  }
  func.func @transform_3(%arg0: i32) -> (i32, i32) {
    %c0_i32 = arith.constant 0 : i32
    %c0_i32_0 = arith.constant 0 : i32
    %c0_i32_1 = arith.constant 0 : i32
    return %c0_i32, %c0_i32_0 : i32, i32
  }
  func.func @transform_4(%arg0: i32) -> (i32, i32) {
    %c0_i32 = arith.constant 0 : i32
    %c0_i32_0 = arith.constant 0 : i32
    %c0_i32_1 = arith.constant 0 : i32
    return %c0_i32, %c0_i32_0 : i32, i32
  }
  func.func @transform_5(%arg0: i32) -> (i32, i32) {
    %c0_i32 = arith.constant 0 : i32
    %c0_i32_0 = arith.constant 0 : i32
    %c0_i32_1 = arith.constant 0 : i32
    return %c0_i32, %c0_i32_0 : i32, i32
  }
  func.func @transform_6(%arg0: i32) -> (i32, i32) {
    %c0_i32 = arith.constant 0 : i32
    %c0_i32_0 = arith.constant 0 : i32
    %c0_i32_1 = arith.constant 0 : i32
    return %c0_i32, %c0_i32_0 : i32, i32
  }
  func.func @transform_7(%arg0: i32) -> (i32, i32) {
    %c0_i32 = arith.constant 0 : i32
    %c0_i32_0 = arith.constant 0 : i32
    return %arg0, %c0_i32 : i32, i32
  }
}

</mosaic_0001>

<bundles_post_ra>
// kernel: tpu_custom_call.1
= control target key start
LH: loop header
LB: loop body
LE: loop exit
PB: predicated region body
PF: predicated region fallthrough
CT: control target
= control target key end

     0   :  { %12 = vsyncpa [#allocation3], 0  ;;  %s1417_s0 = inlined_call_operand.hbm [shape: bf16[16,128], index: 0, kind: input, shape index: {}]   ;;  %s1418_s1 = inlined_call_operand.hbm [shape: bf16[128,512], index: 1, kind: input, shape index: {}]   ;;  %s1419_s2 = inlined_call_operand.vmem [shape: f32[1,512], index: 2, kind: input, shape index: {}]   ;;  %s1420_s3 = inlined_call_operand.hbm [shape: bf16[512,128], index: 3, kind: input, shape index: {}]   ;;  %s1421_s4 = inlined_call_operand.vmem [shape: f32[1,128], index: 4, kind: input, shape index: {}]   ;;  %s1422_s5 = inlined_call_operand.hbm [shape: bf16[128,128], index: 5, kind: input, shape index: {}]   ;;  %s1423_s6 = inlined_call_operand.vmem [shape: f32[1,128], index: 6, kind: input, shape index: {}]   ;;  %s1424_s7 = inlined_call_operand.hbm [shape: bf16[16,128], index: 7, kind: output, shape index: {}]  }
   0x1   :  { %13 = vsyncpa [#allocation6], 0 }
   0x2   :  { %14 = vsyncpa [#allocation9], 0 }
   0x3   :  { %15 = vsyncpa [#allocation4], 0  ;;  %s1268_s24 = smov [#allocation5]   ;;  %s1150_s28 = scalar_lea.hbm %s1418_s1, 4096 }
   0x4   :  { %s33_s25 = sshll.u32 %s1268_s24, 4  ;;  %p1151_p0 = scmp.ne.s32.totalorder %s1418_s1, %s1150_s28  ;;  %s34_s25 = int_to_ptr.vmem [resolvable:$true] %s33_s25 }
   0x5   :  { %p1154_p1 = scmp.lt.u32.totalorder %s1150_s28, %s1418_s1 }
   0x7   :  { %p1156_p2 = pnand %p1154_p1, %p1151_p0 }
   0x9   :  { %1159 = shalt.err (!%p1156_p2)
}
   0xa   :  { %s1160_s10 = scalar_lea.vmem %s34_s25, 4096  ;;  %p1165_p4 = scmp.lt.s32.totalorder %s34_s25, %s34_s25 }
   0xb   :  { %p1161_p3 = scmp.ne.s32.totalorder %s34_s25, %s1160_s10  ;;  %p1166_p5 = scmp.lt.s32.totalorder %s1160_s10, %s1160_s10 }
   0xd   :  { %p1167_p6 = por %p1166_p5, %p1165_p4 }
   0xf   :  { %p1168_p7 = pnand %p1167_p6, %p1161_p3 }
  0x11   :  { %1171 = shalt.err (!%p1168_p7)
}
  0x12   :  { %s1269_s11 = smov 256   ;;  %s1270_s12 = smov 16  }
  0x13   :  { %39 = dma.hbm_to_vmem [thread:$0]  %s1418_s1, 4096, %s34_s25, [#allocation6], %s1269_s11, %s1269_s11, %s1270_s12  }
  0x14   :  { %s1271_s15 = smov [#allocation2]   ;;  %s1172_s19 = scalar_lea.hbm %s1417_s0, 128 }
  0x15   :  { %s21_s16 = sshll.u32 %s1271_s15, 4  ;;  %p1173_p8 = scmp.ne.s32.totalorder %s1417_s0, %s1172_s19  ;;  %s22_s16 = int_to_ptr.vmem [resolvable:$true] %s21_s16 }
  0x16   :  { %p1176_p9 = scmp.lt.u32.totalorder %s1172_s19, %s1417_s0 }
  0x18   :  { %p1178_p10 = pnand %p1176_p9, %p1173_p8 }
  0x1a   :  { %1181 = shalt.err (!%p1178_p10)
}
  0x1b   :  { %s1182_s24 = scalar_lea.vmem %s22_s16, 128  ;;  %p1187_p12 = scmp.lt.s32.totalorder %s22_s16, %s22_s16 }
  0x1c   :  { %p1183_p11 = scmp.ne.s32.totalorder %s22_s16, %s1182_s24  ;;  %p1188_p13 = scmp.lt.s32.totalorder %s1182_s24, %s1182_s24 }
  0x1e   :  { %p1189_p0 = por %p1188_p13, %p1187_p12 }
  0x20   :  { %p1190_p1 = pnand %p1189_p0, %p1183_p11 }
  0x22   :  { %1193 = shalt.err (!%p1190_p1)
}
  0x23   :  { %s1272_s1 = smov 64   ;;  %s1273_s25 = smov 4  }
  0x24   :  { %27 = dma.hbm_to_vmem [thread:$0]  %s1417_s0, 128, %s22_s16, [#allocation3], %s1272_s1, %s1272_s1, %s1273_s25  }
  0x25   :  { %s1274_s28 = smov [#allocation7]   ;;  %s1275_s30 = smov [#allocation8]  }
  0x26   :  { %s47_s29 = sshll.u32 %s1274_s28, 4  ;;  %s61_s8 = sshll.u32 %s1275_s30, 4  ;;  %s48_s29 = int_to_ptr.vmem [resolvable:$true] %s47_s29  ;;  %s1347_s8 = int_to_ptr.vmem [resolvable:$true] %s61_s8 }
  0x27   :  { %s1194_s11 = scalar_lea.hbm %s1420_s3, 4096 }
  0x28   :  { %p1195_p2 = scmp.ne.s32.totalorder %s1420_s3, %s1194_s11  ;;  %p1198_p3 = scmp.lt.u32.totalorder %s1194_s11, %s1420_s3 }
  0x2a   :  { %p1200_p4 = pnand %p1198_p3, %p1195_p2 }
  0x2c   :  { %1203 = shalt.err (!%p1200_p4)
}
  0x2d   :  { %s1204_s0 = scalar_lea.vmem %s48_s29, 4096  ;;  %p1209_p6 = scmp.lt.s32.totalorder %s48_s29, %s48_s29 }
  0x2e   :  { %p1205_p5 = scmp.ne.s32.totalorder %s48_s29, %s1204_s0  ;;  %p1210_p7 = scmp.lt.s32.totalorder %s1204_s0, %s1204_s0 }
  0x30   :  { %p1211_p8 = por %p1210_p7, %p1209_p6 }
  0x32   :  { %p1212_p9 = pnand %p1211_p8, %p1205_p5 }
  0x34   :  { %1215 = shalt.err (!%p1212_p9)
}
  0x35   :  { %53 = dma.hbm_to_vmem [thread:$0]  %s1420_s3, 4096, %s48_s29, [#allocation6], %s1272_s1, %s1272_s1, %s1273_s25  }
  0x36   :  { %s1216_s20 = scalar_lea.hbm %s1422_s5, 1024 }
  0x37   :  { %p1217_p10 = scmp.ne.s32.totalorder %s1422_s5, %s1216_s20  ;;  %p1220_p11 = scmp.lt.u32.totalorder %s1216_s20, %s1422_s5 }
  0x39   :  { %p1222_p12 = pnand %p1220_p11, %p1217_p10 }
  0x3b   :  { %1225 = shalt.err (!%p1222_p12)
}
  0x3c   :  { %s1226_s26 = scalar_lea.vmem %s1347_s8, 1024  ;;  %p1231_p0 = scmp.lt.s32.totalorder %s1347_s8, %s1347_s8 }
  0x3d   :  { %p1227_p13 = scmp.ne.s32.totalorder %s1347_s8, %s1226_s26  ;;  %p1232_p1 = scmp.lt.s32.totalorder %s1226_s26, %s1226_s26 }
  0x3f   :  { %p1233_p2 = por %p1232_p1, %p1231_p0 }
  0x41   :  { %p1234_p3 = pnand %p1233_p2, %p1227_p13 }
  0x43   :  { %1237 = shalt.err (!%p1234_p3)
}
  0x44   :  { %67 = dma.hbm_to_vmem [thread:$0]  %s1422_s5, 1024, %s1347_s8, [#allocation9], %s1272_s1, %s1272_s1, %s1273_s25  }
  0x45   :  { %1260 = dma.done.wait [#allocation3], 128  }
  0x46   :  { %1261 = vsyncadd [#allocation3], 4294967168 }
  0x47   :  { %1262 = dma.done.wait [#allocation6], 8192  }
  0x48   :  { %1263 = vsyncadd [#allocation6], 4294959104 }
  0x49   :  { %1264 = dma.done.wait [#allocation9], 1024  }
  0x4a   :  { %1265 = vsyncadd [#allocation9], 4294966272  ;;  %v1276_v0 = vmov 0   ;;  %v1061_v1 = vld [vmem:[#allocation5 + $0x4] ss:$16 sps:$4 sm:$0xff]   ;;  %v1109_v34 = vld [vmem:[#allocation2] sm:$0xff]  }
  0x4b   :  { %337 = vmatprep.mubr.bf16.mxu0 %v1276_v0  ;;  %380 = vmatprep.mubr.bf16.mxu1 %v1276_v0  ;;  %v1063_v2 = vld [vmem:[#allocation5 + $0xc] ss:$16 sps:$4 sm:$0xff]   ;;  %v1065_v3 = vld [vmem:[#allocation5] ss:$16 sps:$4 sm:$0xff]   ;;  %v1066_v4 = vld [vmem:[#allocation5 + $0x8] ss:$16 sps:$4 sm:$0xff]  }
  0x4c   :  { %305 = vmatprep.subr.bf16.mxu0 %v1061_v1  ;;  %348 = vmatprep.subr.bf16.mxu1 %v1063_v2  ;;  %v1067_v5 = vld [vmem:[#allocation5 + $0x24] ss:$16 sps:$4 sm:$0xff]   ;;  %v1069_v6 = vld [vmem:[#allocation5 + $0x2c] ss:$16 sps:$4 sm:$0xff]   ;;  %v1071_v7 = vld [vmem:[#allocation5 + $0x20] ss:$16 sps:$4 sm:$0xff]  }
  0x4d   :  { %306 = vmatpush1.bf16.msra.mxu0 %v1065_v3  ;;  %349 = vmatpush1.bf16.msra.mxu1 %v1066_v4  ;;  %v1072_v8 = vld [vmem:[#allocation5 + $0x28] ss:$16 sps:$4 sm:$0xff]   ;;  %v1073_v9 = vld [vmem:[#allocation5 + $0x44] ss:$16 sps:$4 sm:$0xff]   ;;  %v1075_v10 = vld [vmem:[#allocation5 + $0x4c] ss:$16 sps:$4 sm:$0xff]   ;;  %v119_v3 = vlaneseq }
  0x4e   :  { %307 = vmatprep.subr.bf16.mxu0 %v1067_v5  ;;  %350 = vmatprep.subr.bf16.mxu1 %v1069_v6  ;;  %v1077_v11 = vld [vmem:[#allocation5 + $0x40] ss:$16 sps:$4 sm:$0xff]   ;;  %v1078_v12 = vld [vmem:[#allocation5 + $0x48] ss:$16 sps:$4 sm:$0xff]   ;;  %v1079_v13 = vld [vmem:[#allocation5 + $0x64] ss:$16 sps:$4 sm:$0xff]  }
  0x4f   :  { %v1081_v14 = vld [vmem:[#allocation5 + $0x6c] ss:$16 sps:$4 sm:$0xff]   ;;  %v1083_v15 = vld [vmem:[#allocation5 + $0x60] ss:$16 sps:$4 sm:$0xff]   ;;  %v1084_v16 = vld [vmem:[#allocation5 + $0x68] ss:$16 sps:$4 sm:$0xff]  }
  0x50   :  { %v1085_v17 = vld [vmem:[#allocation5 + $0x84] ss:$16 sps:$4 sm:$0xff]   ;;  %v1087_v18 = vld [vmem:[#allocation5 + $0x8c] ss:$16 sps:$4 sm:$0xff]   ;;  %v1089_v19 = vld [vmem:[#allocation5 + $0x80] ss:$16 sps:$4 sm:$0xff]  }
  0x51   :  { %308 = vmatpush1.bf16.msra.mxu0 %v1071_v7  ;;  %351 = vmatpush1.bf16.msra.mxu1 %v1072_v8  ;;  %v1090_v20 = vld [vmem:[#allocation5 + $0x88] ss:$16 sps:$4 sm:$0xff]   ;;  %v1091_v21 = vld [vmem:[#allocation5 + $0xa4] ss:$16 sps:$4 sm:$0xff]   ;;  %v1093_v22 = vld [vmem:[#allocation5 + $0xac] ss:$16 sps:$4 sm:$0xff]  }
  0x52   :  { %309 = vmatprep.subr.bf16.mxu0 %v1073_v9  ;;  %352 = vmatprep.subr.bf16.mxu1 %v1075_v10  ;;  %v1095_v23 = vld [vmem:[#allocation5 + $0xa0] ss:$16 sps:$4 sm:$0xff]   ;;  %v1096_v24 = vld [vmem:[#allocation5 + $0xa8] ss:$16 sps:$4 sm:$0xff]   ;;  %v1097_v25 = vld [vmem:[#allocation5 + $0xc4] ss:$16 sps:$4 sm:$0xff]  }
  0x53   :  { %v1099_v26 = vld [vmem:[#allocation5 + $0xcc] ss:$16 sps:$4 sm:$0xff]   ;;  %v1101_v27 = vld [vmem:[#allocation5 + $0xc0] ss:$16 sps:$4 sm:$0xff]   ;;  %v1102_v28 = vld [vmem:[#allocation5 + $0xc8] ss:$16 sps:$4 sm:$0xff]  }
  0x54   :  { %v1103_v29 = vld [vmem:[#allocation5 + $0xe4] ss:$16 sps:$4 sm:$0xff]   ;;  %v1105_v30 = vld [vmem:[#allocation5 + $0xec] ss:$16 sps:$4 sm:$0xff]   ;;  %v1107_v31 = vld [vmem:[#allocation5 + $0xe0] ss:$16 sps:$4 sm:$0xff]  }
  0x55   :  { %310 = vmatpush1.bf16.msra.mxu0 %v1077_v11  ;;  %353 = vmatpush1.bf16.msra.mxu1 %v1078_v12  ;;  %v1108_v32 = vld [vmem:[#allocation5 + $0xe8] ss:$16 sps:$4 sm:$0xff]   ;;  %v1110_v33 = vld [vmem:[#allocation7 + $0x40] sm:$0xff]   ;;  %v1118_v42 = vld [vmem:[#allocation7 + $0x50] sm:$0xff]   ;;  %v1277_v2 = vmov 0.0   ;;  %v120_v4 = vshrl.u32 %v119_v3, 7 }
  0x56   :  { %311 = vmatprep.subr.bf16.mxu0 %v1079_v13  ;;  %354 = vmatprep.subr.bf16.mxu1 %v1081_v14  ;;  %v1111_v35 = vld [vmem:[#allocation7 + $0xc0] sm:$0xff]   ;;  %v1114_v38 = vld [vmem:[#allocation7 + $0x48] sm:$0xff]   ;;  %v1119_v43 = vld [vmem:[#allocation7 + $0xd0] sm:$0xff]   ;;  %vm1278_vm0 = vmmov 0   ;;  %s1279_s8 = smov [#allocation10]  }
  0x57   :  { %v1112_v36 = vld [vmem:[#allocation7] sm:$0xff]   ;;  %v1115_v39 = vld [vmem:[#allocation7 + $0xc8] sm:$0xff]   ;;  %v1120_v44 = vld [vmem:[#allocation7 + $0x10] sm:$0xff]   ;;  %v121_v5 = vsub.s32 0, %v120_v4  ;;  %v129_v6 = vsub.s32 2, %v120_v4  ;;  %v125_v8 = vsub.s32 1, %v120_v4 }
  0x58   :  { %v1113_v37 = vld [vmem:[#allocation7 + $0x80] sm:$0xff]   ;;  %v1116_v40 = vld [vmem:[#allocation7 + $0x8] sm:$0xff]   ;;  %v1121_v45 = vld [vmem:[#allocation7 + $0x90] sm:$0xff]   ;;  %v133_v9 = vsub.s32 3, %v120_v4  ;;  %s878_s9 = sshll.u32 %s1279_s8, 4  ;;  %s879_s9 = int_to_ptr.vmem [resolvable:$true] %s878_s9 }
  0x59   :  { %312 = vmatpush1.bf16.msra.mxu0 %v1083_v15  ;;  %355 = vmatpush1.bf16.msra.mxu1 %v1084_v16  ;;  %v1117_v41 = vld [vmem:[#allocation7 + $0x88] sm:$0xff]   ;;  %v1122_v46 = vld [vmem:[#allocation7 + $0x58] sm:$0xff]   ;;  %v1126_v50 = vld [vmem:[#allocation7 + $0x60] sm:$0xff]   ;;  %s1238_s10 = scalar_lea.vmem %s879_s9, 128  ;;  %p1243_p5 = scmp.lt.s32.totalorder %s879_s9, %s879_s9 }
  0x5a   :  { %313 = vmatprep.subr.bf16.mxu0 %v1085_v17  ;;  %356 = vmatprep.subr.bf16.mxu1 %v1087_v18  ;;  %v1123_v47 = vld [vmem:[#allocation7 + $0xd8] sm:$0xff]   ;;  %v1127_v51 = vld [vmem:[#allocation7 + $0xe0] sm:$0xff]   ;;  %v1130_v54 = vld [vmem:[#allocation7 + $0x68] sm:$0xff]   ;;  %p1239_p4 = scmp.ne.s32.totalorder %s879_s9, %s1238_s10  ;;  %p1244_p6 = scmp.lt.s32.totalorder %s1238_s10, %s1238_s10 }
  0x5b   :  { %v1124_v48 = vld [vmem:[#allocation7 + $0x18] sm:$0xff]   ;;  %v1128_v52 = vld [vmem:[#allocation7 + $0x20] sm:$0xff]   ;;  %v1131_v55 = vld [vmem:[#allocation7 + $0xe8] sm:$0xff]  }
  0x5c   :  { %v1125_v49 = vld [vmem:[#allocation7 + $0x98] sm:$0xff]   ;;  %v1129_v53 = vld [vmem:[#allocation7 + $0xa0] sm:$0xff]   ;;  %v1132_v56 = vld [vmem:[#allocation7 + $0x28] sm:$0xff]   ;;  %p1245_p7 = por %p1244_p6, %p1243_p5 }
  0x5d   :  { %314 = vmatpush1.bf16.msra.mxu0 %v1089_v19  ;;  %357 = vmatpush1.bf16.msra.mxu1 %v1090_v20  ;;  %v1133_v57 = vld [vmem:[#allocation7 + $0xa8] sm:$0xff]   ;;  %v1134_v58 = vld [vmem:[#allocation7 + $0x70] sm:$0xff]   ;;  %v1138_v62 = vld [vmem:[#allocation7 + $0x78] sm:$0xff]  }
  0x5e   :  { %315 = vmatprep.subr.bf16.mxu0 %v1091_v21  ;;  %358 = vmatprep.subr.bf16.mxu1 %v1093_v22  ;;  %v1135_v59 = vld [vmem:[#allocation7 + $0xf0] sm:$0xff]   ;;  %v1139_v63 = vld [vmem:[#allocation7 + $0xf8] sm:$0xff]   ;;  %p1246_p8 = pnand %p1245_p7, %p1239_p4 }
  0x5f   :  { %v1136_v60 = vld [vmem:[#allocation7 + $0x30] sm:$0xff]   ;;  %v1140_v0 = vld [vmem:[#allocation7 + $0x38] sm:$0xff]  }
  0x60   :  { %v1137_v61 = vld [vmem:[#allocation7 + $0xb0] sm:$0xff]   ;;  %v1141_v1 = vld [vmem:[#allocation7 + $0xb8] sm:$0xff]  }
  0x61   :  { %316 = vmatpush1.bf16.msra.mxu0 %v1095_v23  ;;  %359 = vmatpush1.bf16.msra.mxu1 %v1096_v24  ;;  %v117_v7 = vld [vmem:[%s1419_s2] sm:$0xf] }
  0x62   :  { %317 = vmatprep.subr.bf16.mxu0 %v1097_v25  ;;  %360 = vmatprep.subr.bf16.mxu1 %v1099_v26  ;;  %v122_v10 = vrot.slane %v117_v7, %v121_v5  ;;  %v130_v11 = vrot.slane %v117_v7, %v129_v6  ;;  %v126_v12 = vrot.slane %v117_v7, %v125_v8  ;;  %v958_v6 = vld [vmem:[%s1423_s6] ss:$0 sm:$0xff] }
  0x63   :  { %v134_v13 = vrot.slane %v117_v7, %v133_v9 }
  0x65   :  { %318 = vmatpush1.bf16.msra.mxu0 %v1101_v27  ;;  %361 = vmatpush1.bf16.msra.mxu1 %v1102_v28 }
  0x66   :  { %319 = vmatprep.subr.bf16.mxu0 %v1103_v29  ;;  %362 = vmatprep.subr.bf16.mxu1 %v1105_v30 }
  0x69   :  { %320 = vmatpush1.bf16.msra.mxu0 %v1107_v31  ;;  %363 = vmatpush1.bf16.msra.mxu1 %v1108_v32 }
  0x6a   :  { %976 = vmatprep.subr.bf16.mxu0 %v1110_v33  ;;  %998 = vmatprep.subr.bf16.mxu1 %v1111_v35 }
  0x6c   :  { %338 = vmatmul.mubr.bf16.vlgmr.msra.gmra.mrb[0].mxu0 %v1109_v34  ;;  %381 = vmatmul.mubr.bf16.vlgmr.msra.gmra.mrb[0].mxu1 %v1109_v34 }
  0x6d   :  { %977 = vmatpush3.bf16.msra.mxu0 %v1112_v36  ;;  %999 = vmatpush3.bf16.msra.mxu1 %v1113_v37 }
  0x6e   :  { %978 = vmatprep.subr.bf16.mxu0 %v1114_v38  ;;  %1000 = vmatprep.subr.bf16.mxu1 %v1115_v39 }
  0x71   :  { %979 = vmatpush3.bf16.msra.mxu0 %v1116_v40  ;;  %1001 = vmatpush3.bf16.msra.mxu1 %v1117_v41 }
  0x72   :  { %980 = vmatprep.subr.bf16.mxu0 %v1118_v42  ;;  %1002 = vmatprep.subr.bf16.mxu1 %v1119_v43  ;;  %v1142_v42 = vld [vmem:[#allocation8] sm:$0xff]   ;;  %v1143_v43 = vld [vmem:[#allocation8 + $0x8] sm:$0xff]  }
  0x75   :  { %981 = vmatpush3.bf16.msra.mxu0 %v1120_v44  ;;  %1003 = vmatpush3.bf16.msra.mxu1 %v1121_v45  ;;  %v1144_v44 = vld [vmem:[#allocation8 + $0x10] sm:$0xff]   ;;  %v1145_v45 = vld [vmem:[#allocation8 + $0x18] sm:$0xff]  }
  0x76   :  { %982 = vmatprep.subr.bf16.mxu0 %v1122_v46  ;;  %1004 = vmatprep.subr.bf16.mxu1 %v1123_v47  ;;  %v1146_v46 = vld [vmem:[#allocation8 + $0x20] sm:$0xff]   ;;  %v1147_v47 = vld [vmem:[#allocation8 + $0x28] sm:$0xff]  }
  0x79   :  { %983 = vmatpush3.bf16.msra.mxu0 %v1124_v48  ;;  %1005 = vmatpush3.bf16.msra.mxu1 %v1125_v49  ;;  %v1148_v48 = vld [vmem:[#allocation8 + $0x30] sm:$0xff]   ;;  %v1149_v49 = vld [vmem:[#allocation8 + $0x38] sm:$0xff]  }
  0x7a   :  { %984 = vmatprep.subr.bf16.mxu0 %v1126_v50  ;;  %1006 = vmatprep.subr.bf16.mxu1 %v1127_v51 }
  0x7d   :  { %985 = vmatpush3.bf16.msra.mxu0 %v1128_v52  ;;  %1007 = vmatpush3.bf16.msra.mxu1 %v1129_v53  ;;  %v925_v52 = vld [vmem:[%s1421_s4] ss:$0 sm:$0xff] }
  0x7e   :  { %986 = vmatprep.subr.bf16.mxu0 %v1130_v54  ;;  %1008 = vmatprep.subr.bf16.mxu1 %v1131_v55 }
  0x81   :  { %987 = vmatpush3.bf16.msra.mxu0 %v1132_v56  ;;  %1009 = vmatpush3.bf16.msra.mxu1 %v1133_v57 }
  0x82   :  { %988 = vmatprep.subr.bf16.mxu0 %v1134_v58  ;;  %1010 = vmatprep.subr.bf16.mxu1 %v1135_v59 }
  0x85   :  { %989 = vmatpush3.bf16.msra.mxu0 %v1136_v60  ;;  %1011 = vmatpush3.bf16.msra.mxu1 %v1137_v61 }
  0x86   :  { %990 = vmatprep.subr.bf16.mxu0 %v1138_v62  ;;  %1012 = vmatprep.subr.bf16.mxu1 %v1139_v63 }
  0x89   :  { %991 = vmatpush3.bf16.msra.mxu0 %v1140_v0  ;;  %1013 = vmatpush3.bf16.msra.mxu1 %v1141_v1 }
  0x8a   :  { %1029 = vmatprep.subr.bf16.mxu0 %v1277_v2 }
 0x13f   :  { %v339_v14 = vpop.f32.mrb[0].mxu0  ;;  %v382_v15 = vpop.f32.mrb[0].mxu1 }
 0x140   :  { %v340_v16 = vadd.f32 %v339_v14, %v122_v10  ;;  %v383_v17 = vadd.f32 %v382_v15, %v130_v11  ;;  %v341_v18 = vpop.f32.mrb[1].mxu0  ;;  %v384_v19 = vpop.f32.mrb[1].mxu1 }
 0x141   :  { %v342_v20 = vadd.f32 %v341_v18, %v126_v12  ;;  %v385_v21 = vadd.f32 %v384_v19, %v134_v13  ;;  %v343_v22 = vpop.f32.mrb[2].mxu0  ;;  %v386_v23 = vpop.f32.mrb[2].mxu1 }
 0x142   :  { %v393_v24 = vmax.f32 %v383_v17, 0.0  ;;  %v344_v25 = vadd.f32 %v343_v22, %v122_v10  ;;  %v387_v26 = vadd.f32 %v386_v23, %v130_v11  ;;  %v345_v27 = vpop.f32.mrb[3].mxu0  ;;  %v388_v28 = vpop.f32.mrb[3].mxu1  ;;  %v391_v32 = vmax.f32 %v340_v16, 0.0 }
 0x143   :  { %v394_v29 = vmax.f32 %v385_v21, 0.0  ;;  %v346_v30 = vadd.f32 %v345_v27, %v126_v12  ;;  %v389_v31 = vadd.f32 %v388_v28, %v134_v13  ;;  %v392_v35 = vmax.f32 %v342_v20, 0.0 }
 0x144   :  { %v395_v33 = vmax.f32 %v344_v25, 0.0  ;;  %v397_v34 = vmax.f32 %v387_v26, 0.0 }
 0x145   :  { %v396_v36 = vmax.f32 %v346_v30, 0.0  ;;  %v398_v37 = vmax.f32 %v389_v31, 0.0 }
 0x146   :  { %v399_v38 = vpack.c.bf16 %v395_v33, %v391_v32  ;;  %v401_v39 = vpack.c.bf16 %v397_v34, %v393_v24 }
 0x147   :  { %v400_v40 = vpack.c.bf16 %v396_v36, %v392_v35  ;;  %v402_v41 = vpack.c.bf16 %v398_v37, %v394_v29 }
 0x149   :  { %698 = vmatprep.mubr.bf16.mxu0 %v400_v40  ;;  %739 = vmatprep.mubr.bf16.mxu1 %v402_v41 }
 0x14a   :  { %699 = vmatmul.mubr.bf16.vlgmr.msra.gmra.mrb[4].mxu0 %v399_v38  ;;  %740 = vmatmul.mubr.bf16.vlgmr.msra.gmra.mrb[4].mxu1 %v401_v39 }
 0x14b   :  { %1030 = vmatpush3.bf16.msra.mxu0 %v1142_v42  ;;  %1045 = vmatprep.mubr.msk.bf16.mxu0 %vm1278_vm0, %v1277_v2 }
 0x14c   :  { %1031 = vmatprep.subr.bf16.mxu0 %v1277_v2 }
 0x14f   :  { %1032 = vmatpush3.bf16.msra.mxu0 %v1143_v43 }
 0x150   :  { %1033 = vmatprep.subr.bf16.mxu0 %v1277_v2 }
 0x153   :  { %1034 = vmatpush3.bf16.msra.mxu0 %v1144_v44 }
 0x154   :  { %1035 = vmatprep.subr.bf16.mxu0 %v1277_v2 }
 0x157   :  { %1036 = vmatpush3.bf16.msra.mxu0 %v1145_v45 }
 0x158   :  { %1037 = vmatprep.subr.bf16.mxu0 %v1277_v2 }
 0x15b   :  { %1038 = vmatpush3.bf16.msra.mxu0 %v1146_v46 }
 0x15c   :  { %1039 = vmatprep.subr.bf16.mxu0 %v1277_v2 }
 0x15f   :  { %1040 = vmatpush3.bf16.msra.mxu0 %v1147_v47 }
 0x160   :  { %1041 = vmatprep.subr.bf16.mxu0 %v1277_v2 }
 0x163   :  { %1042 = vmatpush3.bf16.msra.mxu0 %v1148_v48 }
 0x164   :  { %1043 = vmatprep.subr.bf16.mxu0 %v1277_v2 }
 0x167   :  { %1044 = vmatpush3.bf16.msra.mxu0 %v1149_v49 }
 0x21d   :  { %v992_v50 = vpop.f32.mrb[4].mxu0  ;;  %v1014_v51 = vpop.f32.mrb[4].mxu1 }
 0x21e   :  { %v993_v53 = vpop.f32.mrb[5].mxu0  ;;  %v1015_v54 = vpop.f32.mrb[5].mxu1 }
 0x21f   :  { %v994_v55 = vadd.f32 %v993_v53, %v992_v50  ;;  %v1016_v56 = vadd.f32 %v1015_v54, %v1014_v51  ;;  %v995_v57 = vpop.f32.mrb[6].mxu0  ;;  %v1017_v58 = vpop.f32.mrb[6].mxu1 }
 0x220   :  { %v996_v59 = vpop.f32.mrb[7].mxu0  ;;  %v1018_v60 = vpop.f32.mrb[7].mxu1 }
 0x221   :  { %v701_v61 = vadd.f32 %v994_v55, %v925_v52  ;;  %v997_v62 = vadd.f32 %v996_v59, %v995_v57  ;;  %v1019_v63 = vadd.f32 %v1018_v60, %v1017_v58 }
 0x223   :  { %v742_v0 = vadd.f32 %v1016_v56, %v701_v61  ;;  %v704_v1 = vadd.f32 %v997_v62, %v925_v52 }
 0x225   :  { %v745_v2 = vadd.f32 %v1019_v63, %v704_v1  ;;  %v748_v3 = vmax.f32 %v742_v0, 0.0 }
 0x227   :  { %v749_v4 = vmax.f32 %v745_v2, 0.0 }
 0x229   :  { %v750_v5 = vpack.c.bf16 %v749_v4, %v748_v3 }
 0x22b   :  { %1046 = vmatmul.mubr.bf16.vlgmr.msra.gmra.mrb[8].mxu0 %v750_v5 }
 0x2fe   :  { %v856_v7 = vpop.f32.mrb[8].mxu0 }
 0x2ff   :  { %v1047_v8 = vpop.f32.mrb[9].mxu0  ;;  %v857_v10 = vadd.f32 %v958_v6, %v856_v7 }
 0x300   :  { %v859_v9 = vpop.f32.mrb[10].mxu0 }
 0x301   :  { %v860_v11 = vadd.f32 %v958_v6, %v859_v9  ;;  %v1048_v12 = vpop.f32.mrb[11].mxu0 }
 0x303   :  { %v974_v13 = vpack.c.bf16 %v860_v11, %v857_v10 }
 0x305   :  { %975 = vst [vmem:[#allocation10] sm:$0xff] %v974_v13  }
 0x306   :  { %1249 = shalt.err (!%p1246_p8)
}
 0x307   :  { %s1250_s12 = scalar_lea.hbm %s1424_s7, 128 }
 0x308   :  { %p1251_p9 = scmp.ne.s32.totalorder %s1424_s7, %s1250_s12  ;;  %p1254_p10 = scmp.lt.u32.totalorder %s1250_s12, %s1424_s7 }
 0x30a   :  { %p1256_p11 = pnand %p1254_p10, %p1251_p9 }
 0x30c   :  { %1259 = shalt.err (!%p1256_p11)
}
 0x30d   :  { %884 = dma.vmem_to_hbm [thread:$0]  %s879_s9, 128, %s1424_s7, [#allocation4], %s1272_s1, %s1272_s1, %s1273_s25  }
 0x30e   :  { %1266 = dma.done.wait [#allocation4], 128  }
 0x30f   :  { %1267 = vsyncadd [#allocation4], 4294967168 }
 0x310   :  { %888 = vsyncpa [#allocation3], 1 }
 0x311   :  { %889 = vsyncpa [#allocation6], 1 }
 0x312   :  { %890 = vsyncpa [#allocation9], 1 }
 0x313   :  { %891 = vsyncpa [#allocation4], 1 }

</bundles_post_ra>
